<compile_context>
chip_gen: v7x
topology: tpu7x:2x2x1
jax: 0.10.0
libtpu: 0.0.40
codegen_flags: <defaults>
</compile_context>

<pallas_src>
import jax
import jax.numpy as jnp
from jax.experimental import pallas as pl
from jax.experimental.pallas import tpu as pltpu

LANE = 128


def _round_up(x, m):
    return ((x + m - 1) // m) * m


# --------------------------------------------------------------------------
# Kernels
# --------------------------------------------------------------------------
def xw1_kernel(x_ref, w1_ref, d_ref, xw1_ref):
    """XW1_scaled row tile = d_row * (X tile @ W1)  (column scaling of A_hat folded in)."""
    xw1 = jnp.dot(x_ref[...], w1_ref[...], preferred_element_type=jnp.float32)
    xw1_ref[...] = (d_ref[...] * xw1).astype(xw1_ref.dtype)


def prop1_kernel(adj_ref, xw1_ref, d_ref, b1_ref, w2_ref, hw2_ref, acc_ref):
    """HW2_scaled row tile = d * ( relu(d * ((A+I)[rows,:] @ XW1_scaled) + b1) @ W2 )."""
    k = pl.program_id(1)
    tk = adj_ref.shape[1]

    @pl.when(k == 0)
    def _():
        acc_ref[...] = jnp.zeros_like(acc_ref)

    off = pl.multiple_of(k * tk, tk)
    acc_ref[...] += jnp.dot(adj_ref[...], xw1_ref[pl.ds(off, tk), :],
                            preferred_element_type=jnp.float32)

    @pl.when(k == pl.num_programs(1) - 1)
    def _():
        d = d_ref[...]
        h1 = jnp.maximum(d * acc_ref[...] + b1_ref[...], 0.0)   # bias after propagation (PyG)
        hw2 = jnp.dot(h1.astype(w2_ref.dtype), w2_ref[...],
                      preferred_element_type=jnp.float32)
        hw2_ref[...] = (d * hw2).astype(hw2_ref.dtype)


def prop2_kernel(adj_ref, hw2_ref, d_ref, b2_ref, out_ref, acc_ref):
    """OUT row tile = sigmoid( d * ((A+I)[rows,:] @ HW2_scaled) + b2 )."""
    k = pl.program_id(1)
    tk = adj_ref.shape[1]

    @pl.when(k == 0)
    def _():
        acc_ref[...] = jnp.zeros_like(acc_ref)

    off = pl.multiple_of(k * tk, tk)
    acc_ref[...] += jnp.dot(adj_ref[...], hw2_ref[pl.ds(off, tk), :],
                            preferred_element_type=jnp.float32)

    @pl.when(k == pl.num_programs(1) - 1)
    def _():
        z = d_ref[...] * acc_ref[...] + b2_ref[0, 0]
        out_ref[...] = 1.0 / (1.0 + jnp.exp(-z))   # exact sigmoid (epilogue, off hot path)


def fused_kernel(x_ref, w1_ref, b1_ref, w2_ref, b2_ref, adj_ref, d_ref, out_ref):
    """Small-N path: whole 2-layer GCN in one body, everything VMEM-resident."""
    d = d_ref[...]
    a = adj_ref[...]
    xw1 = d * jnp.dot(x_ref[...], w1_ref[...], preferred_element_type=jnp.float32)
    h1 = jnp.maximum(
        d * jnp.dot(a, xw1.astype(a.dtype), preferred_element_type=jnp.float32)
        + b1_ref[...], 0.0)
    hw2 = d * jnp.dot(h1.astype(w2_ref.dtype), w2_ref[...],
                      preferred_element_type=jnp.float32)
    z = d * jnp.dot(a, hw2.astype(a.dtype), preferred_element_type=jnp.float32) + b2_ref[0, 0]
    out_ref[...] = 1.0 / (1.0 + jnp.exp(-z))


# --------------------------------------------------------------------------
# Glue (plain JAX): raw adjacency + degree vector, params
# --------------------------------------------------------------------------
def build_adj_and_dinv(edge_index, num_nodes, n_pad):
    """Padded bf16 (A + remaining self-loops), plus f32 d = D^-1/2 column vector.

    The D^-1/2 normalization itself is applied INSIDE the kernels (free VPU work on a
    DMA-bound kernel), so no extra N^2 f32 passes are made here.  Duplicate edges
    scatter-ADD (as in PyG); self-loops are added only where missing.
    """
    src = edge_index[0].astype(jnp.int32)
    dst = edge_index[1].astype(jnp.int32)
    ones_bf = jnp.ones(src.shape, jnp.bfloat16)          # counts exact in bf16 (< 256)
    adj = jnp.zeros((n_pad, n_pad), jnp.bfloat16).at[dst, src].add(ones_bf)

    self_cnt = jnp.zeros((num_nodes,), jnp.float32).at[dst].add(
        (src == dst).astype(jnp.float32))
    missing = (self_cnt == 0.0).astype(jnp.float32)       # add_remaining_self_loops
    ids = jnp.arange(num_nodes, dtype=jnp.int32)
    adj = adj.at[ids, ids].add(missing.astype(jnp.bfloat16))

    deg = jnp.zeros((num_nodes,), jnp.float32).at[dst].add(1.0) + missing
    d_inv_sqrt = jnp.where(deg > 0.0, jax.lax.rsqrt(deg), 0.0)
    d_pad = jnp.zeros((n_pad, 1), jnp.float32).at[:num_nodes, 0].set(d_inv_sqrt)
    return adj, d_pad


def build_norm_adj(edge_index, num_nodes):
    """Dense f32 A_hat = D^-1/2 (A + I) D^-1/2 — used only by the pure-JAX reference."""
    src = edge_index[0]
    dst = edge_index[1]
    adj = jnp.zeros((num_nodes, num_nodes), jnp.float32).at[dst, src].add(1.0)
    diag = jnp.diagonal(adj)
    adj = adj + jnp.diag(jnp.where(diag == 0.0, 1.0, 0.0))
    deg = jnp.sum(adj, axis=1)
    d_inv_sqrt = jnp.where(deg > 0, jax.lax.rsqrt(deg), 0.0)
    return d_inv_sqrt[:, None] * adj * d_inv_sqrt[None, :]


def init_params(key, input_dim, hidden_dim):
    """Deterministic glorot-style init (GCNConv: glorot weights, zero bias)."""
    k1, k2 = jax.random.split(key)
    s1 = jnp.sqrt(6.0 / (input_dim + hidden_dim))
    s2 = jnp.sqrt(6.0 / (hidden_dim + 1))
    return {
        "w1": jax.random.uniform(k1, (input_dim, hidden_dim), jnp.float32, -s1, s1),
        "b1": jnp.zeros((1, hidden_dim), jnp.float32),
        "w2": jax.random.uniform(k2, (hidden_dim, 1), jnp.float32, -s2, s2),
        "b2": jnp.zeros((1, 1), jnp.float32),
    }


def _vmem_cap_bytes():
    # Generation-aware ceiling: v7x has 64 MiB physical VMEM / TC -> cap ~48 MiB;
    # v5e/v6e have 128 MiB -> cap at 100 MiB.  Always leave headroom for Mosaic scratch.
    try:
        cap = int(getattr(pltpu.get_tpu_info(), "vmem_capacity_bytes", 0)) or (128 << 20)
    except Exception:
        cap = 128 << 20
    return min(cap - (16 << 20), 100 << 20)


def _compiler_params(semantics, resident_bytes):
    limit = int(min(max(resident_bytes + (8 << 20), 32 << 20), _vmem_cap_bytes()))
    if semantics is None:
        return pltpu.CompilerParams(vmem_limit_bytes=limit)
    return pltpu.CompilerParams(dimension_semantics=semantics, vmem_limit_bytes=limit)


# --------------------------------------------------------------------------
# Forward pass
# --------------------------------------------------------------------------
def gnn_landmark_selector(x, edge_index, params):
    n, f = x.shape
    hidden = params["w1"].shape[1]
    h_pad = _round_up(hidden, LANE)                      # lane-dense hidden dim

    fused = n <= 1024
    if fused:
        n_pad = _round_up(n, LANE)
    else:
        n_pad = _round_up(n, 256)                        # decoupled from tile size
        tm = 512 if n_pad % 512 == 0 else 256
        tk = next(t for t in (2048, 1024, 512, 256) if n_pad % t == 0)
        grid_rows = n_pad // tm                          # >= 2 here (n_pad >= 1280)
        grid_k = n_pad // tk

    # ---- operands: bf16 matmul inputs, f32 bias / d vector, zero padding ----
    adj_p, d_p = build_adj_and_dinv(edge_index, n, n_pad)
    x_p = jnp.zeros((n_pad, f), jnp.bfloat16).at[:n, :].set(x.astype(jnp.bfloat16))
    w1_p = jnp.zeros((f, h_pad), jnp.bfloat16).at[:, :hidden].set(
        params["w1"].astype(jnp.bfloat16))
    b1_p = jnp.zeros((1, h_pad), jnp.float32).at[:, :hidden].set(params["b1"])
    w2_p = jnp.zeros((h_pad, LANE), jnp.bfloat16).at[:hidden, :1].set(
        params["w2"].astype(jnp.bfloat16))
    b2_p = params["b2"].reshape(1, 1).astype(jnp.float32)

    if fused:
        out = pl.pallas_call(
            fused_kernel,
            out_shape=jax.ShapeDtypeStruct((n_pad, LANE), jnp.float32),
            in_specs=[pl.BlockSpec(memory_space=pltpu.MemorySpace.VMEM),   # x
                      pl.BlockSpec(memory_space=pltpu.MemorySpace.VMEM),   # w1
                      pl.BlockSpec(memory_space=pltpu.MemorySpace.VMEM),   # b1
                      pl.BlockSpec(memory_space=pltpu.MemorySpace.VMEM),   # w2
                      pl.BlockSpec(memory_space=pltpu.MemorySpace.SMEM),   # b2 scalar
                      pl.BlockSpec(memory_space=pltpu.MemorySpace.VMEM),   # (A+I)
                      pl.BlockSpec(memory_space=pltpu.MemorySpace.VMEM)],  # d
            out_specs=pl.BlockSpec(memory_space=pltpu.MemorySpace.VMEM),
            compiler_params=_compiler_params(
                None,
                n_pad * n_pad * 2 + n_pad * (f + 2 * h_pad) * 2
                + n_pad * LANE * 6 + (f * h_pad + h_pad * LANE) * 2 + n_pad * 4),
            cost_estimate=pl.CostEstimate(
                flops=int(2 * n_pad * f * h_pad + 2 * n_pad * n_pad * (h_pad + LANE)
                          + 2 * n_pad * h_pad * LANE),
                transcendentals=int(n_pad * LANE),
                bytes_accessed=int(n_pad * n_pad * 2 + n_pad * f * 2
                                   + n_pad * LANE * 4 + n_pad * 4
                                   + (f * h_pad + h_pad * LANE) * 2)),
        )(x_p, w1_p, b1_p, w2_p, b2_p, adj_p, d_p)
        return out[:n, :1]

    # ---- kernel 1: XW1_scaled = d * (X @ W1), row-tiled ----
    xw1 = pl.pallas_call(
        xw1_kernel,
        out_shape=jax.ShapeDtypeStruct((n_pad, h_pad), jnp.bfloat16),
        grid_spec=pltpu.PrefetchScalarGridSpec(
            num_scalar_prefetch=0,
            grid=(grid_rows,),
            in_specs=[pl.BlockSpec((tm, f), lambda i: (i, 0)),
                      pl.BlockSpec((f, h_pad), lambda i: (0, 0)),
                      pl.BlockSpec((tm, 1), lambda i: (i, 0))],
            out_specs=pl.BlockSpec((tm, h_pad), lambda i: (i, 0)),
        ),
        compiler_params=_compiler_params(
            ("parallel",),
            2 * (tm * f + tm * h_pad) * 2 + f * h_pad * 2 + 2 * tm * 4),
        cost_estimate=pl.CostEstimate(
            flops=int(2 * n_pad * f * h_pad),
            transcendentals=0,
            bytes_accessed=int((n_pad * f + f * h_pad + n_pad * h_pad) * 2 + n_pad * 4)),
    )(x_p, w1_p, d_p)

    adj_tile_b = tm * tk * 2  # bf16 adjacency tile

    # ---- kernel 2: HW2_scaled = d * (relu(d * (A+I) @ XW1_scaled + b1) @ W2) ----
    #      XW1_scaled is VMEM-resident (single block, index_map -> (0,0)).
    hw2 = pl.pallas_call(
        prop1_kernel,
        out_shape=jax.ShapeDtypeStruct((n_pad, LANE), jnp.bfloat16),
        grid_spec=pltpu.PrefetchScalarGridSpec(
            num_scalar_prefetch=0,
            grid=(grid_rows, grid_k),
            in_specs=[pl.BlockSpec((tm, tk), lambda i, k: (i, k)),          # (A+I) tile
                      pl.BlockSpec((n_pad, h_pad), lambda i, k: (0, 0)),    # XW1 resident
                      pl.BlockSpec((tm, 1), lambda i, k: (i, 0)),           # d rows
                      pl.BlockSpec((1, h_pad), lambda i, k: (0, 0)),        # b1
                      pl.BlockSpec((h_pad, LANE), lambda i, k: (0, 0))],    # w2
            out_specs=pl.BlockSpec((tm, LANE), lambda i, k: (i, 0)),
            scratch_shapes=[pltpu.VMEM((tm, h_pad), jnp.float32)],
        ),
        compiler_params=_compiler_params(
            ("parallel", "arbitrary"),
            2 * adj_tile_b + n_pad * h_pad * 2 + tm * h_pad * 4
            + 2 * tm * LANE * 2 + h_pad * LANE * 2 + h_pad * 4 + 2 * tm * 4),
        cost_estimate=pl.CostEstimate(
            flops=int(2 * n_pad * n_pad * h_pad + 2 * n_pad * h_pad * LANE),
            transcendentals=0,
            bytes_accessed=int(n_pad * n_pad * 2 + n_pad * h_pad * 2
                               + n_pad * LANE * 2 + h_pad * LANE * 2
                               + h_pad * 4 + n_pad * 4)),
    )(adj_p, xw1, d_p, b1_p, w2_p)

    # ---- kernel 3: OUT = sigmoid(d * (A+I) @ HW2_scaled + b2), HW2 resident ----
    out = pl.pallas_call(
        prop2_kernel,
        out_shape=jax.ShapeDtypeStruct((n_pad, LANE), jnp.float32),
        grid_spec=pltpu.PrefetchScalarGridSpec(
            num_scalar_prefetch=0,
            grid=(grid_rows, grid_k),
            in_specs=[pl.BlockSpec((tm, tk), lambda i, k: (i, k)),          # (A+I) tile
                      pl.BlockSpec((n_pad, LANE), lambda i, k: (0, 0)),     # HW2 resident
                      pl.BlockSpec((tm, 1), lambda i, k: (i, 0)),           # d rows
                      pl.BlockSpec(memory_space=pltpu.MemorySpace.SMEM)],   # b2 scalar
            out_specs=pl.BlockSpec((tm, LANE), lambda i, k: (i, 0)),
            scratch_shapes=[pltpu.VMEM((tm, LANE), jnp.float32)],
        ),
        compiler_params=_compiler_params(
            ("parallel", "arbitrary"),
            2 * adj_tile_b + n_pad * LANE * 2 + tm * LANE * 4
            + 2 * tm * LANE * 4 + 2 * tm * 4),
        cost_estimate=pl.CostEstimate(
            flops=int(2 * n_pad * n_pad * LANE),
            transcendentals=int(n_pad * LANE),
            bytes_accessed=int(n_pad * n_pad * 2 + n_pad * LANE * 2
                               + n_pad * LANE * 4 + n_pad * 4)),
    )(adj_p, hw2, d_p, b2_p)

    return out[:n, :1]


# --------------------------------------------------------------------------
# Pure-JAX reference (f32) for a sanity check
# --------------------------------------------------------------------------
def gnn_landmark_selector_ref(x, edge_index, params):
    adj = build_norm_adj(edge_index, x.shape[0])
    h1 = jnp.maximum(adj @ (x @ params["w1"]) + params["b1"], 0.0)
    h2 = adj @ (h1 @ params["w2"]) + params["b2"]
    return jax.nn.sigmoid(h2)


if __name__ == "__main__":
    key = jax.random.PRNGKey(0)
    kx, kp = jax.random.split(key)

    input_dim = 8
    hidden_dim = 32
    params = init_params(kp, input_dim, hidden_dim)

    def ring_graph(num_nodes):
        fwd = jnp.stack([jnp.arange(num_nodes), (jnp.arange(num_nodes) + 1) % num_nodes])
        bwd = jnp.stack([(jnp.arange(num_nodes) + 1) % num_nodes, jnp.arange(num_nodes)])
        return jnp.concatenate([fwd, bwd], axis=1).astype(jnp.int32)   # [2, 2N]

    # --- small graph -> fused single-kernel path ---
    n_small = 16
    x_s = jax.random.normal(kx, (n_small, input_dim), dtype=jnp.float32)
    e_s = ring_graph(n_small)
    out_s = jax.block_until_ready(gnn_landmark_selector(x_s, e_s, params))
    ref_s = gnn_landmark_selector_ref(x_s, e_s, params)
    assert out_s.shape == (n_small, 1)
    assert bool(jnp.all((out_s >= 0.0) & (out_s <= 1.0)))
    assert bool(jnp.max(jnp.abs(out_s - ref_s)) < 0.06)   # bf16 matmuls, f32 accumulate

    # --- moderate graph -> 3-kernel tiled path (resident XW1/HW2, K reduction) ---
    n_big = 1500
    x_b = jax.random.normal(kx, (n_big, input_dim), dtype=jnp.float32)
    e_b = ring_graph(n_big)
    out_b = jax.block_until_ready(gnn_landmark_selector(x_b, e_b, params))
    ref_b = gnn_landmark_selector_ref(x_b, e_b, params)
    assert out_b.shape == (n_big, 1)
    assert bool(jnp.all((out_b >= 0.0) & (out_b <= 1.0)))
    assert bool(jnp.max(jnp.abs(out_b - ref_b)) < 0.06)

    print("KERNEL_OK")
</pallas_src>

<mosaic_0001>
module attributes {stable_mosaic.version = 11 : i64} {
  func.func @fused_kernel(%arg0: memref<128x8xbf16, #tpu.memory_space<vmem>>, %arg1: memref<8x128xbf16, #tpu.memory_space<vmem>>, %arg2: memref<1x128xf32, #tpu.memory_space<vmem>>, %arg3: memref<128x128xbf16, #tpu.memory_space<vmem>>, %arg4: memref<1x1xf32, #tpu.memory_space<smem>>, %arg5: memref<128x128xbf16, #tpu.memory_space<vmem>>, %arg6: memref<128x1xf32, #tpu.memory_space<vmem>>, %arg7: memref<128x128xf32, #tpu.memory_space<vmem>>) attributes {dimension_semantics = [], scalar_prefetch = 0 : i64, scratch_operands = 0 : i64, tpu.core_type = #tpu.core_type<tc>} {
    %c0 = arith.constant 0 : index
    %c0_0 = arith.constant 0 : index
    %0 = vector.load %arg6[%c0, %c0_0] : memref<128x1xf32, #tpu.memory_space<vmem>>, vector<128x1xf32>
    %c0_1 = arith.constant 0 : index
    %c0_2 = arith.constant 0 : index
    %1 = vector.load %arg5[%c0_1, %c0_2] : memref<128x128xbf16, #tpu.memory_space<vmem>>, vector<128x128xbf16>
    %c0_3 = arith.constant 0 : index
    %c0_4 = arith.constant 0 : index
    %2 = vector.load %arg0[%c0_3, %c0_4] : memref<128x8xbf16, #tpu.memory_space<vmem>>, vector<128x8xbf16>
    %c0_5 = arith.constant 0 : index
    %c0_6 = arith.constant 0 : index
    %3 = vector.load %arg1[%c0_5, %c0_6] : memref<8x128xbf16, #tpu.memory_space<vmem>>, vector<8x128xbf16>
    %cst = arith.constant dense<0.000000e+00> : vector<128x128xf32>
    %4 = tpu.matmul %2, %3, %cst {dimension_numbers = #tpu.dot_dimension_numbers<[1], [0], [0], [1], [0, 0, 1, 1], [], []>} : vector<128x8xbf16>, vector<8x128xbf16>, vector<128x128xf32> -> vector<128x128xf32>
    %5 = vector.broadcast %0 : vector<128x1xf32> to vector<128x128xf32>
    %6 = arith.mulf %5, %4 : vector<128x128xf32>
    %7 = arith.truncf %6 : vector<128x128xf32> to vector<128x128xbf16>
    %cst_7 = arith.constant dense<0.000000e+00> : vector<128x128xf32>
    %8 = tpu.matmul %1, %7, %cst_7 {dimension_numbers = #tpu.dot_dimension_numbers<[1], [0], [0], [1], [0, 0, 1, 1], [], []>} : vector<128x128xbf16>, vector<128x128xbf16>, vector<128x128xf32> -> vector<128x128xf32>
    %9 = vector.broadcast %0 : vector<128x1xf32> to vector<128x128xf32>
    %10 = arith.mulf %9, %8 : vector<128x128xf32>
    %c0_8 = arith.constant 0 : index
    %c0_9 = arith.constant 0 : index
    %11 = vector.load %arg2[%c0_8, %c0_9] : memref<1x128xf32, #tpu.memory_space<vmem>>, vector<1x128xf32>
    %12 = vector.broadcast %11 : vector<1x128xf32> to vector<128x128xf32>
    %13 = arith.addf %10, %12 : vector<128x128xf32>
    %cst_10 = arith.constant 0.000000e+00 : f32
    %14 = vector.broadcast %cst_10 : f32 to vector<128x128xf32>
    %15 = arith.maximumf %13, %14 : vector<128x128xf32>
    %16 = arith.truncf %15 : vector<128x128xf32> to vector<128x128xbf16>
    %c0_11 = arith.constant 0 : index
    %c0_12 = arith.constant 0 : index
    %17 = vector.load %arg3[%c0_11, %c0_12] : memref<128x128xbf16, #tpu.memory_space<vmem>>, vector<128x128xbf16>
    %cst_13 = arith.constant dense<0.000000e+00> : vector<128x128xf32>
    %18 = tpu.matmul %16, %17, %cst_13 {dimension_numbers = #tpu.dot_dimension_numbers<[1], [0], [0], [1], [0, 0, 1, 1], [], []>} : vector<128x128xbf16>, vector<128x128xbf16>, vector<128x128xf32> -> vector<128x128xf32>
    %19 = vector.broadcast %0 : vector<128x1xf32> to vector<128x128xf32>
    %20 = arith.mulf %19, %18 : vector<128x128xf32>
    %21 = arith.truncf %20 : vector<128x128xf32> to vector<128x128xbf16>
    %cst_14 = arith.constant dense<0.000000e+00> : vector<128x128xf32>
    %22 = tpu.matmul %1, %21, %cst_14 {dimension_numbers = #tpu.dot_dimension_numbers<[1], [0], [0], [1], [0, 0, 1, 1], [], []>} : vector<128x128xbf16>, vector<128x128xbf16>, vector<128x128xf32> -> vector<128x128xf32>
    %23 = vector.broadcast %0 : vector<128x1xf32> to vector<128x128xf32>
    %24 = arith.mulf %23, %22 : vector<128x128xf32>
    %c0_15 = arith.constant 0 : index
    %c0_16 = arith.constant 0 : index
    %25 = memref.load %arg4[%c0_15, %c0_16] : memref<1x1xf32, #tpu.memory_space<smem>>
    %26 = vector.broadcast %25 : f32 to vector<128x128xf32>
    %27 = arith.addf %24, %26 : vector<128x128xf32>
    %cst_17 = arith.constant 0.000000e+00 : f32
    %28 = vector.broadcast %cst_17 : f32 to vector<128x128xf32>
    %29 = arith.subf %28, %27 : vector<128x128xf32>
    %30 = math.exp %29 : vector<128x128xf32>
    %cst_18 = arith.constant 1.000000e+00 : f32
    %31 = vector.broadcast %cst_18 : f32 to vector<128x128xf32>
    %32 = arith.addf %31, %30 : vector<128x128xf32>
    %cst_19 = arith.constant 1.000000e+00 : f32
    %33 = vector.broadcast %cst_19 : f32 to vector<128x128xf32>
    %34 = arith.divf %33, %32 : vector<128x128xf32>
    %c0_20 = arith.constant 0 : index
    %c0_21 = arith.constant 0 : index
    %35 = vector.load %arg7[%c0_20, %c0_21] : memref<128x128xf32, #tpu.memory_space<vmem>>, vector<128x128xf32>
    tpu.vector_store %arg7[%c0_20, %c0_21], %34 {strides = array<i32>} : memref<128x128xf32, #tpu.memory_space<vmem>>, vector<128x128xf32>,
    return
  }
}

</mosaic_0001>

<bundles_post_ra>
// kernel: tpu_custom_call.1
= control target key start
LH: loop header
LB: loop body
LE: loop exit
PB: predicated region body
PF: predicated region fallthrough
CT: control target
= control target key end

     0   :  { %vm143_vm0 = vcmask 1043456   ;;  %vm118_vm1 = vcmask 64512   ;;  %v1339_v5 = vmov 0   ;;  %s1692_s0 = inlined_call_operand.vmem [shape: bf16[128,8], index: 0, kind: input, shape index: {}]   ;;  %s1693_s1 = inlined_call_operand.vmem [shape: bf16[8,128], index: 1, kind: input, shape index: {}]   ;;  %s1694_s2 = inlined_call_operand.vmem [shape: f32[1,128], index: 2, kind: input, shape index: {}]   ;;  %s1695_s3 = inlined_call_operand.vmem [shape: bf16[128,128], index: 3, kind: input, shape index: {}]   ;;  %s1696_s4 = inlined_call_operand.<no memory space> [shape: f32[1,1], index: 4, kind: input, shape index: {}]   ;;  %s1697_s5 = inlined_call_operand.vmem [shape: bf16[128,128], index: 5, kind: input, shape index: {}]   ;;  %s1698_s6 = inlined_call_operand.vmem [shape: f32[128,1], index: 6, kind: input, shape index: {}]   ;;  %s1699_s7 = inlined_call_operand.hbm [shape: f32[128,128], index: 7, kind: output, shape index: {}]  }
   0x1   :  { %v77_v0 = vld [vmem:[%s1693_s1] sm:$0xf]  ;;  %v1228_v3 = vld [vmem:[%s1692_s0 + $0x8] sm:$0xff]   ;;  %v1229_v4 = vld [vmem:[%s1692_s0 + $0x10] sm:$0xff]   ;;  %1225 = vset.pattern.permute.xlu0 %v1339_v5  ;;  %1226 = vset.pattern.permute.xlu1 %v1339_v5 }
   0x2   :  { %v1227_v1 = vld [vmem:[%s1692_s0] sm:$0xff]   ;;  %1220 = vmatprep.subr.msk.bf16.mxu0 %vm143_vm0, %v77_v0  ;;  %v145_v2 = vsel %vm143_vm0, %v77_v0, 0  ;;  %v1230_v7 = vld [vmem:[%s1692_s0 + $0x18] sm:$0xff]   ;;  %v31_v8 = vld [vmem:[%s1698_s6 + $0x10] sm:$0xff] }
   0x3   :  { %1091 = vmatpush3.bf16.msra.mxu0 %v145_v2  ;;  %1092 = vmatprep.mubr.msk.bf16.mxu0 %vm118_vm1, %v1227_v1  ;;  %v29_v6 = vld [vmem:[%s1698_s6] sm:$0xff]  ;;  %v30_v10 = vld [vmem:[%s1698_s6 + $0x8] sm:$0xff]  ;;  %v32_v11 = vld [vmem:[%s1698_s6 + $0x18] sm:$0xff] }
   0x4   :  { %246 = vperm.xlu0 %1225, %v29_v6   ;;  %v1231_v9 = vld [vmem:[%s1692_s0 + $0x20] sm:$0xff]   ;;  %256 = vperm.xlu1 %1226, %v31_v8   ;;  %v34_v13 = vld [vmem:[%s1698_s6 + $0x28] sm:$0xff]  ;;  %v1233_v15 = vld [vmem:[%s1692_s0 + $0x30] sm:$0xff]  }
   0x5   :  { %v33_v12 = vld [vmem:[%s1698_s6 + $0x20] sm:$0xff]  ;;  %v1232_v14 = vld [vmem:[%s1692_s0 + $0x28] sm:$0xff]   ;;  %v35_v16 = vld [vmem:[%s1698_s6 + $0x30] sm:$0xff] }
   0x6   :  { %1093 = vmatmul.mubr.msk.bf16.vlgmr.msra.gmra.mrb[0].mxu0 %vm118_vm1, %v1228_v3  ;;  %v36_v17 = vld [vmem:[%s1698_s6 + $0x38] sm:$0xff]  ;;  %v37_v18 = vld [vmem:[%s1698_s6 + $0x40] sm:$0xff]  ;;  %v38_v19 = vld [vmem:[%s1698_s6 + $0x48] sm:$0xff] }
   0x7   :  { %1096 = vmatprep.mubr.msk.bf16.mxu0 %vm118_vm1, %v1229_v4 }
   0x8   :  { %251 = vperm.xlu0 %1225, %v30_v10   ;;  %261 = vperm.xlu1 %1226, %v32_v11  }
   0xc   :  { %266 = vperm.xlu0 %1225, %v33_v12   ;;  %271 = vperm.xlu1 %1226, %v34_v13  }
   0xe   :  { %1097 = vmatmul.mubr.msk.bf16.gmra.mrb[4].mxu0 %vm118_vm1, %v1230_v7 }
   0xf   :  { %1100 = vmatprep.mubr.msk.bf16.mxu0 %vm118_vm1, %v1231_v9 }
  0x10   :  { %276 = vperm.xlu0 %1225, %v35_v16   ;;  %281 = vperm.xlu1 %1226, %v36_v17  }
  0x16   :  { %1101 = vmatmul.mubr.msk.bf16.gmra.mrb[8].mxu0 %vm118_vm1, %v1232_v14 }
  0x17   :  { %1104 = vmatprep.mubr.msk.bf16.mxu0 %vm118_vm1, %v1233_v15 }
  0x18   :  { %13 = vsyncpa [#allocation4], 0  ;;  %v1234_v20 = vld [vmem:[%s1692_s0 + $0x38] sm:$0xff]   ;;  %286 = vperm.xlu0 %1225, %v37_v18   ;;  %291 = vperm.xlu1 %1226, %v38_v19   ;;  %v39_v21 = vld [vmem:[%s1698_s6 + $0x50] sm:$0xff] }
  0x19   :  { %v40_v22 = vld [vmem:[%s1698_s6 + $0x58] sm:$0xff]  ;;  %v41_v23 = vld [vmem:[%s1698_s6 + $0x60] sm:$0xff]  ;;  %v42_v24 = vld [vmem:[%s1698_s6 + $0x68] sm:$0xff] }
  0x1a   :  { %v43_v25 = vld [vmem:[%s1698_s6 + $0x70] sm:$0xff]  ;;  %v44_v26 = vld [vmem:[%s1698_s6 + $0x78] sm:$0xff]  ;;  %v1469_v27 = vld [vmem:[%s1697_s5] sm:$0xff]  }
  0x1b   :  { %1124 = vmatprep.mubr.bf16.mxu1 %v1469_v27  ;;  %v1243_v28 = vld [vmem:[%s1695_s3] sm:$0xff]   ;;  %v1244_v29 = vld [vmem:[%s1695_s3 + $0x8] sm:$0xff]   ;;  %v1245_v30 = vld [vmem:[%s1695_s3 + $0x10] sm:$0xff]  }
  0x1c   :  { %296 = vperm.xlu0 %1225, %v39_v21   ;;  %301 = vperm.xlu1 %1226, %v40_v22   ;;  %v1246_v31 = vld [vmem:[%s1695_s3 + $0x18] sm:$0xff]   ;;  %v1247_v32 = vld [vmem:[%s1695_s3 + $0x20] sm:$0xff]  }
  0x1d   :  { %1140 = vmatprep.subr.bf16.mxu0 %v1243_v28 }
  0x1e   :  { %1105 = vmatmul.mubr.msk.bf16.gmra.mrb[12].mxu0 %vm118_vm1, %v1234_v20 }
  0x1f   :  { %1141 = vmatpush3.bf16.msra.mxu0 %v1243_v28  ;;  %v1547_v28 = vld [vmem:[%s1697_s5 + $0x18] sm:$0xff]  }
  0x20   :  { %306 = vperm.xlu0 %1225, %v41_v23   ;;  %311 = vperm.xlu1 %1226, %v42_v24  }
  0x21   :  { %1142 = vmatprep.subr.bf16.mxu0 %v1244_v29 }
  0x23   :  { %1143 = vmatpush3.bf16.msra.mxu0 %v1244_v29  ;;  %v1552_v29 = vld [vmem:[%s1697_s5 + $0x20] sm:$0xff]  }
  0x24   :  { %316 = vperm.xlu0 %1225, %v43_v25   ;;  %321 = vperm.xlu1 %1226, %v44_v26   ;;  %v1538_v25 = vld [vmem:[%s1697_s5 + $0x8] sm:$0xff]   ;;  %v1237_v26 = vld [vmem:[%s1697_s5 + $0x10] sm:$0xff]  }
  0x25   :  { %1144 = vmatprep.subr.bf16.mxu0 %v1245_v30 }
  0x27   :  { %1145 = vmatpush3.bf16.msra.mxu0 %v1245_v30  ;;  %v1559_v30 = vld [vmem:[%s1697_s5 + $0x28] sm:$0xff]  }
  0x28   :  { %1146 = vmatprep.subr.bf16.mxu0 %v1246_v31 }
  0x2b   :  { %1147 = vmatpush3.bf16.msra.mxu0 %v1246_v31  ;;  %v1564_v31 = vld [vmem:[%s1697_s5 + $0x30] sm:$0xff]  }
  0x2c   :  { %1148 = vmatprep.subr.bf16.mxu0 %v1247_v32 }
  0x2f   :  { %1149 = vmatpush3.bf16.msra.mxu0 %v1247_v32  ;;  %v1571_v32 = vld [vmem:[%s1697_s5 + $0x38] sm:$0xff]  }
  0x83   :  { %v1487_v33 = vpop.permute.xlu0 %246  ;;  %v1489_v34 = vpop.permute.xlu1 %256 }
  0x87   :  { %v1491_v35 = vpop.permute.xlu0 %251  ;;  %v1493_v36 = vpop.permute.xlu1 %261 }
  0x8b   :  { %v1495_v37 = vpop.permute.xlu0 %266  ;;  %v1497_v38 = vpop.permute.xlu1 %271 }
  0x8f   :  { %v1499_v40 = vpop.permute.xlu0 %276  ;;  %v1501_v42 = vpop.permute.xlu1 %281 }
  0x97   :  { %v1507_v51 = vpop.permute.xlu0 %286  ;;  %v1509_v52 = vpop.permute.xlu1 %291 }
  0x9b   :  { %v1515_v61 = vpop.permute.xlu0 %296  ;;  %v1517_v63 = vpop.permute.xlu1 %301 }
  0x9f   :  { %v1519_v4 = vpop.permute.xlu0 %306  ;;  %v1523_v8 = vpop.permute.xlu1 %311 }
  0xa3   :  { %v1527_v14 = vpop.permute.xlu0 %316  ;;  %v1529_v16 = vpop.permute.xlu1 %321 }
  0xd9   :  { %v1094_v39 = vpop.f32.mrb[0].mxu0 }
  0xda   :  { %v181_v41 = vpop.f32.mrb[1].mxu0  ;;  %v326_v44 = vmul.f32 %v1094_v39, %v1489_v34  ;;  %v1248_v39 = vld [vmem:[%s1695_s3 + $0x28] sm:$0xff]  }
  0xdb   :  { %v1095_v43 = vpop.f32.mrb[2].mxu0  ;;  %v324_v47 = vmul.f32 %v1487_v33, %v181_v41  ;;  %1150 = vmatprep.subr.bf16.mxu0 %v1248_v39  ;;  %v1249_v41 = vld [vmem:[%s1695_s3 + $0x30] sm:$0xff]  }
  0xdc   :  { %v327_v45 = vmul.f32 %v1095_v43, %v1493_v36  ;;  %v184_v46 = vpop.f32.mrb[3].mxu0  ;;  %1151 = vmatpush3.bf16.msra.mxu0 %v1248_v39  ;;  %v1250_v43 = vld [vmem:[%s1695_s3 + $0x38] sm:$0xff]  }
  0xdd   :  { %v325_v48 = vmul.f32 %v1491_v35, %v184_v46  ;;  %1152 = vmatprep.subr.bf16.mxu0 %v1249_v41 }
  0xde   :  { %v341_v49 = vpack.c.bf16 %v327_v45, %v326_v44  ;;  %v1586_v45 = vld [vmem:[%s1694_s2] ss:$0 sm:$0xff] }
  0xdf   :  { %v340_v50 = vpack.c.bf16 %v325_v48, %v324_v47 }
  0xe0   :  { %1153 = vmatpush3.bf16.msra.mxu0 %v1249_v41 }
  0xe1   :  { %v1098_v53 = vpop.f32.mrb[4].mxu0  ;;  %1108 = vmatprep.subr.bf16.mxu1 %v340_v50  ;;  %1154 = vmatprep.subr.bf16.mxu0 %v1250_v43 }
  0xe2   :  { %v197_v54 = vpop.f32.mrb[5].mxu0  ;;  %1109 = vmatpush3.bf16.msra.mxu1 %v340_v50  ;;  %v330_v56 = vmul.f32 %v1098_v53, %v1499_v40 }
  0xe3   :  { %v1099_v55 = vpop.f32.mrb[6].mxu0  ;;  %1110 = vmatprep.subr.bf16.mxu1 %v341_v49  ;;  %v328_v59 = vmul.f32 %v1495_v37, %v197_v54 }
  0xe4   :  { %v331_v57 = vmul.f32 %v1099_v55, %v1501_v42  ;;  %v200_v58 = vpop.f32.mrb[7].mxu0  ;;  %1155 = vmatpush3.bf16.msra.mxu0 %v1250_v43 }
  0xe5   :  { %v329_v60 = vmul.f32 %v1497_v38, %v200_v58 }
  0xe6   :  { %v343_v62 = vpack.c.bf16 %v331_v57, %v330_v56  ;;  %1111 = vmatpush3.bf16.msra.mxu1 %v341_v49 }
  0xe7   :  { %v342_v0 = vpack.c.bf16 %v329_v60, %v328_v59 }
  0xe9   :  { %v1102_v1 = vpop.f32.mrb[8].mxu0  ;;  %1112 = vmatprep.subr.bf16.mxu1 %v342_v0 }
  0xea   :  { %v213_v2 = vpop.f32.mrb[9].mxu0  ;;  %1113 = vmatpush3.bf16.msra.mxu1 %v342_v0  ;;  %v334_v5 = vmul.f32 %v1102_v1, %v1515_v61 }
  0xeb   :  { %v1103_v3 = vpop.f32.mrb[10].mxu0  ;;  %1114 = vmatprep.subr.bf16.mxu1 %v343_v62  ;;  %v332_v9 = vmul.f32 %v1507_v51, %v213_v2 }
  0xec   :  { %v335_v6 = vmul.f32 %v1103_v3, %v1517_v63  ;;  %v216_v7 = vpop.f32.mrb[11].mxu0 }
  0xed   :  { %v333_v10 = vmul.f32 %v1509_v52, %v216_v7 }
  0xee   :  { %v345_v11 = vpack.c.bf16 %v335_v6, %v334_v5  ;;  %1115 = vmatpush3.bf16.msra.mxu1 %v343_v62 }
  0xef   :  { %v344_v12 = vpack.c.bf16 %v333_v10, %v332_v9 }
  0xf1   :  { %v1106_v13 = vpop.f32.mrb[12].mxu0  ;;  %1116 = vmatprep.subr.bf16.mxu1 %v344_v12 }
  0xf2   :  { %v229_v15 = vpop.f32.mrb[13].mxu0  ;;  %1117 = vmatpush3.bf16.msra.mxu1 %v344_v12  ;;  %v338_v18 = vmul.f32 %v1106_v13, %v1527_v14 }
  0xf3   :  { %v1107_v17 = vpop.f32.mrb[14].mxu0  ;;  %1118 = vmatprep.subr.bf16.mxu1 %v345_v11  ;;  %v336_v21 = vmul.f32 %v1519_v4, %v229_v15 }
  0xf4   :  { %v339_v19 = vmul.f32 %v1107_v17, %v1529_v16  ;;  %v232_v20 = vpop.f32.mrb[15].mxu0 }
  0xf5   :  { %v337_v22 = vmul.f32 %v1523_v8, %v232_v20 }
  0xf6   :  { %v347_v23 = vpack.c.bf16 %v339_v19, %v338_v18  ;;  %1119 = vmatpush3.bf16.msra.mxu1 %v345_v11 }
  0xf7   :  { %v346_v24 = vpack.c.bf16 %v337_v22, %v336_v21 }
  0xf9   :  { %1120 = vmatprep.subr.bf16.mxu1 %v346_v24 }
  0xfa   :  { %1121 = vmatpush3.bf16.msra.mxu1 %v346_v24 }
  0xfb   :  { %1122 = vmatprep.subr.bf16.mxu1 %v347_v23 }
  0xfe   :  { %1123 = vmatpush3.bf16.msra.mxu1 %v347_v23 }
 0x101   :  { %1125 = vmatmul.mubr.bf16.vlgmr.msra.gmra.mrb[0].mxu1 %v1538_v25 }
 0x102   :  { %1128 = vmatprep.mubr.bf16.mxu1 %v1237_v26 }
 0x109   :  { %1129 = vmatmul.mubr.bf16.gmra.mrb[4].mxu1 %v1547_v28 }
 0x10a   :  { %1132 = vmatprep.mubr.bf16.mxu1 %v1552_v29 }
 0x111   :  { %1133 = vmatmul.mubr.bf16.gmra.mrb[8].mxu1 %v1559_v30 }
 0x112   :  { %1136 = vmatprep.mubr.bf16.mxu1 %v1564_v31 }
 0x119   :  { %1137 = vmatmul.mubr.bf16.gmra.mrb[12].mxu1 %v1571_v32 }
 0x11a   :  { %1192 = vmatprep.mubr.bf16.mxu1 %v1237_v26 }
 0x1d4   :  { %v1126_v44 = vpop.f32.mrb[0].mxu1 }
 0x1d5   :  { %v495_v46 = vmul.f32 %v1126_v44, %v1489_v34  ;;  %v430_v47 = vpop.f32.mrb[1].mxu1 }
 0x1d6   :  { %v493_v48 = vmul.f32 %v430_v47, %v1487_v33  ;;  %v1127_v49 = vpop.f32.mrb[2].mxu1 }
 0x1d7   :  { %v518_v50 = vadd.f32 %v1586_v45, %v495_v46  ;;  %v496_v53 = vmul.f32 %v1127_v49, %v1493_v36  ;;  %v433_v54 = vpop.f32.mrb[3].mxu1 }
 0x1d8   :  { %v516_v55 = vadd.f32 %v1586_v45, %v493_v48  ;;  %v494_v56 = vmul.f32 %v433_v54, %v1491_v35 }
 0x1d9   :  { %v519_v57 = vadd.f32 %v1586_v45, %v496_v53  ;;  %v534_v59 = vmax.f32 %v518_v50, 0.0 }
 0x1da   :  { %v517_v58 = vadd.f32 %v1586_v45, %v494_v56  ;;  %v532_v62 = vmax.f32 %v516_v55, 0.0 }
 0x1db   :  { %v535_v60 = vmax.f32 %v519_v57, 0.0 }
 0x1dc   :  { %v533_v0 = vmax.f32 %v517_v58, 0.0  ;;  %v1130_v1 = vpop.f32.mrb[4].mxu1 }
 0x1dd   :  { %v549_v2 = vpack.c.bf16 %v535_v60, %v534_v59  ;;  %v499_v3 = vmul.f32 %v1130_v1, %v1499_v40  ;;  %v446_v5 = vpop.f32.mrb[5].mxu1 }
 0x1de   :  { %v497_v6 = vmul.f32 %v446_v5, %v1495_v37  ;;  %v1131_v7 = vpop.f32.mrb[6].mxu1  ;;  %v548_v9 = vpack.c.bf16 %v533_v0, %v532_v62 }
 0x1df   :  { %v522_v10 = vadd.f32 %v1586_v45, %v499_v3  ;;  %v500_v11 = vmul.f32 %v1131_v7, %v1501_v42  ;;  %v449_v12 = vpop.f32.mrb[7].mxu1 }
 0x1e0   :  { %v520_v13 = vadd.f32 %v1586_v45, %v497_v6  ;;  %v498_v15 = vmul.f32 %v449_v12, %v1497_v38  ;;  %1156 = vmatprep.mubr.bf16.mxu0 %v548_v9 }
 0x1e1   :  { %v523_v17 = vadd.f32 %v1586_v45, %v500_v11  ;;  %1157 = vmatmul.mubr.bf16.vlgmr.msra.gmra.mrb[16].mxu0 %v549_v2  ;;  %v538_v19 = vmax.f32 %v522_v10, 0.0 }
 0x1e2   :  { %v521_v18 = vadd.f32 %v1586_v45, %v498_v15  ;;  %v536_v21 = vmax.f32 %v520_v13, 0.0 }
 0x1e3   :  { %v539_v20 = vmax.f32 %v523_v17, 0.0 }
 0x1e4   :  { %v537_v22 = vmax.f32 %v521_v18, 0.0  ;;  %v1134_v23 = vpop.f32.mrb[8].mxu1 }
 0x1e5   :  { %v503_v24 = vmul.f32 %v1134_v23, %v1515_v61  ;;  %v462_v26 = vpop.f32.mrb[9].mxu1  ;;  %v551_v39 = vpack.c.bf16 %v539_v20, %v538_v19 }
 0x1e6   :  { %v501_v41 = vmul.f32 %v462_v26, %v1507_v51  ;;  %v1135_v43 = vpop.f32.mrb[10].mxu1  ;;  %v550_v44 = vpack.c.bf16 %v537_v22, %v536_v21 }
 0x1e7   :  { %v526_v46 = vadd.f32 %v1586_v45, %v503_v24  ;;  %v504_v47 = vmul.f32 %v1135_v43, %v1517_v63  ;;  %v465_v48 = vpop.f32.mrb[11].mxu1 }
 0x1e8   :  { %v524_v49 = vadd.f32 %v1586_v45, %v501_v41  ;;  %v502_v50 = vmul.f32 %v465_v48, %v1509_v52  ;;  %1160 = vmatprep.mubr.bf16.mxu0 %v550_v44 }
 0x1e9   :  { %v527_v53 = vadd.f32 %v1586_v45, %v504_v47  ;;  %1161 = vmatmul.mubr.bf16.gmra.mrb[20].mxu0 %v551_v39  ;;  %v542_v55 = vmax.f32 %v526_v46, 0.0 }
 0x1ea   :  { %v525_v54 = vadd.f32 %v1586_v45, %v502_v50  ;;  %v540_v57 = vmax.f32 %v524_v49, 0.0 }
 0x1eb   :  { %v543_v56 = vmax.f32 %v527_v53, 0.0 }
 0x1ec   :  { %v541_v58 = vmax.f32 %v525_v54, 0.0  ;;  %v1138_v59 = vpop.f32.mrb[12].mxu1 }
 0x1ed   :  { %v507_v60 = vmul.f32 %v1138_v59, %v1527_v14  ;;  %v478_v62 = vpop.f32.mrb[13].mxu1  ;;  %v553_v0 = vpack.c.bf16 %v543_v56, %v542_v55 }
 0x1ee   :  { %v505_v1 = vmul.f32 %v478_v62, %v1519_v4  ;;  %v1139_v2 = vpop.f32.mrb[14].mxu1  ;;  %v552_v3 = vpack.c.bf16 %v541_v58, %v540_v57 }
 0x1ef   :  { %v530_v5 = vadd.f32 %v1586_v45, %v507_v60  ;;  %v508_v6 = vmul.f32 %v1139_v2, %v1529_v16  ;;  %v481_v7 = vpop.f32.mrb[15].mxu1 }
 0x1f0   :  { %v528_v9 = vadd.f32 %v1586_v45, %v505_v1  ;;  %v506_v10 = vmul.f32 %v481_v7, %v1523_v8  ;;  %1164 = vmatprep.mubr.bf16.mxu0 %v552_v3 }
 0x1f1   :  { %v531_v11 = vadd.f32 %v1586_v45, %v508_v6  ;;  %1165 = vmatmul.mubr.bf16.gmra.mrb[24].mxu0 %v553_v0  ;;  %v546_v13 = vmax.f32 %v530_v5, 0.0 }
 0x1f2   :  { %v529_v12 = vadd.f32 %v1586_v45, %v506_v10  ;;  %v544_v17 = vmax.f32 %v528_v9, 0.0 }
 0x1f3   :  { %v547_v15 = vmax.f32 %v531_v11, 0.0 }
 0x1f4   :  { %v545_v18 = vmax.f32 %v529_v12, 0.0 }
 0x1f5   :  { %v555_v19 = vpack.c.bf16 %v547_v15, %v546_v13 }
 0x1f6   :  { %v554_v20 = vpack.c.bf16 %v545_v18, %v544_v17 }
 0x1f8   :  { %1168 = vmatprep.mubr.bf16.mxu0 %v554_v20  ;;  %v1646_v20 = vstv %s1696_s4  ;;  %s1340_s4 = smov [#allocation3]  }
 0x1f9   :  { %1169 = vmatmul.mubr.bf16.gmra.mrb[28].mxu0 %v555_v19  ;;  %s989_s8 = sshll.u32 %s1340_s4, 4  ;;  %s990_s8 = int_to_ptr.vmem [resolvable:$true] %s989_s8 }
 0x1fa   :  { %1188 = vmatprep.mubr.bf16.mxu0 %v1469_v27  ;;  %s1315_s1 = scalar_lea.vmem %s990_s8, 2048  ;;  %p1320_p1 = scmp.lt.s32.totalorder %s990_s8, %s990_s8 }
 0x1fb   :  { %p1316_p0 = scmp.ne.s32.totalorder %s990_s8, %s1315_s1  ;;  %p1321_p2 = scmp.lt.s32.totalorder %s1315_s1, %s1315_s1 }
 0x1fd   :  { %p1322_p3 = por %p1321_p2, %p1320_p1 }
 0x1ff   :  { %p1323_p4 = pnand %p1322_p3, %p1316_p0 }
 0x2b4   :  { %v1158_v21 = vpop.f32.mrb[16].mxu0 }
 0x2b5   :  { %v654_v22 = vpop.f32.mrb[17].mxu0  ;;  %v719_v24 = vmul.f32 %v1158_v21, %v1489_v34 }
 0x2b6   :  { %v1159_v23 = vpop.f32.mrb[18].mxu0  ;;  %v717_v45 = vmul.f32 %v654_v22, %v1487_v33 }
 0x2b7   :  { %v720_v26 = vmul.f32 %v1159_v23, %v1493_v36  ;;  %v657_v39 = vpop.f32.mrb[19].mxu0 }
 0x2b8   :  { %v718_v41 = vmul.f32 %v657_v39, %v1491_v35 }
 0x2b9   :  { %v734_v43 = vpack.c.bf16 %v720_v26, %v719_v24 }
 0x2ba   :  { %v733_v44 = vpack.c.bf16 %v718_v41, %v717_v45 }
 0x2bc   :  { %v1162_v46 = vpop.f32.mrb[20].mxu0  ;;  %1172 = vmatprep.subr.bf16.mxu0 %v733_v44  ;;  %1204 = vmatprep.subr.bf16.mxu1 %v733_v44 }
 0x2bd   :  { %v670_v47 = vpop.f32.mrb[21].mxu0  ;;  %1173 = vmatpush3.bf16.msra.mxu0 %v733_v44  ;;  %1212 = vmatpush3.bf16.msra.mxu1 %v733_v44  ;;  %v723_v48 = vmul.f32 %v1162_v46, %v1499_v40 }
 0x2be   :  { %v1163_v27 = vpop.f32.mrb[22].mxu0  ;;  %1174 = vmatprep.subr.bf16.mxu0 %v734_v43  ;;  %1205 = vmatprep.subr.bf16.mxu1 %v734_v43  ;;  %v721_v53 = vmul.f32 %v670_v47, %v1495_v37 }
 0x2bf   :  { %v724_v49 = vmul.f32 %v1163_v27, %v1501_v42  ;;  %v673_v50 = vpop.f32.mrb[23].mxu0 }
 0x2c0   :  { %v722_v54 = vmul.f32 %v673_v50, %v1497_v38 }
 0x2c1   :  { %v736_v55 = vpack.c.bf16 %v724_v49, %v723_v48  ;;  %1175 = vmatpush3.bf16.msra.mxu0 %v734_v43  ;;  %1213 = vmatpush3.bf16.msra.mxu1 %v734_v43 }
 0x2c2   :  { %v735_v56 = vpack.c.bf16 %v722_v54, %v721_v53 }
 0x2c4   :  { %v1166_v57 = vpop.f32.mrb[24].mxu0  ;;  %1176 = vmatprep.subr.bf16.mxu0 %v735_v56  ;;  %1206 = vmatprep.subr.bf16.mxu1 %v735_v56 }
 0x2c5   :  { %v686_v58 = vpop.f32.mrb[25].mxu0  ;;  %1177 = vmatpush3.bf16.msra.mxu0 %v735_v56  ;;  %1214 = vmatpush3.bf16.msra.mxu1 %v735_v56  ;;  %v727_v60 = vmul.f32 %v1166_v57, %v1515_v61 }
 0x2c6   :  { %v1167_v59 = vpop.f32.mrb[26].mxu0  ;;  %1178 = vmatprep.subr.bf16.mxu0 %v736_v55  ;;  %1207 = vmatprep.subr.bf16.mxu1 %v736_v55  ;;  %v725_v1 = vmul.f32 %v686_v58, %v1507_v51 }
 0x2c7   :  { %v728_v62 = vmul.f32 %v1167_v59, %v1517_v63  ;;  %v689_v0 = vpop.f32.mrb[27].mxu0 }
 0x2c8   :  { %v726_v2 = vmul.f32 %v689_v0, %v1509_v52 }
 0x2c9   :  { %v738_v3 = vpack.c.bf16 %v728_v62, %v727_v60  ;;  %1179 = vmatpush3.bf16.msra.mxu0 %v736_v55  ;;  %1215 = vmatpush3.bf16.msra.mxu1 %v736_v55 }
 0x2ca   :  { %v737_v5 = vpack.c.bf16 %v726_v2, %v725_v1 }
 0x2cc   :  { %v1170_v6 = vpop.f32.mrb[28].mxu0  ;;  %1180 = vmatprep.subr.bf16.mxu0 %v737_v5  ;;  %1208 = vmatprep.subr.bf16.mxu1 %v737_v5 }
 0x2cd   :  { %v702_v7 = vpop.f32.mrb[29].mxu0  ;;  %1181 = vmatpush3.bf16.msra.mxu0 %v737_v5  ;;  %1216 = vmatpush3.bf16.msra.mxu1 %v737_v5  ;;  %v731_v10 = vmul.f32 %v1170_v6, %v1527_v14 }
 0x2ce   :  { %v1171_v9 = vpop.f32.mrb[30].mxu0  ;;  %1182 = vmatprep.subr.bf16.mxu0 %v738_v3  ;;  %1209 = vmatprep.subr.bf16.mxu1 %v738_v3  ;;  %v729_v13 = vmul.f32 %v702_v7, %v1519_v4 }
 0x2cf   :  { %v732_v11 = vmul.f32 %v1171_v9, %v1529_v16  ;;  %v705_v12 = vpop.f32.mrb[31].mxu0 }
 0x2d0   :  { %v730_v15 = vmul.f32 %v705_v12, %v1523_v8 }
 0x2d1   :  { %v740_v17 = vpack.c.bf16 %v732_v11, %v731_v10  ;;  %1183 = vmatpush3.bf16.msra.mxu0 %v738_v3  ;;  %1217 = vmatpush3.bf16.msra.mxu1 %v738_v3 }
 0x2d2   :  { %v739_v18 = vpack.c.bf16 %v730_v15, %v729_v13 }
 0x2d4   :  { %1184 = vmatprep.subr.bf16.mxu0 %v739_v18  ;;  %1210 = vmatprep.subr.bf16.mxu1 %v739_v18 }
 0x2d5   :  { %1185 = vmatpush3.bf16.msra.mxu0 %v739_v18  ;;  %1218 = vmatpush3.bf16.msra.mxu1 %v739_v18 }
 0x2d6   :  { %1186 = vmatprep.subr.bf16.mxu0 %v740_v17  ;;  %1211 = vmatprep.subr.bf16.mxu1 %v740_v17 }
 0x2d9   :  { %1187 = vmatpush3.bf16.msra.mxu0 %v740_v17  ;;  %1219 = vmatpush3.bf16.msra.mxu1 %v740_v17 }
 0x2dc   :  { %1189 = vmatmul.mubr.bf16.vlgmr.msra.gmra.mrb[32].mxu0 %v1538_v25  ;;  %1193 = vmatmul.mubr.bf16.vlgmr.msra.gmra.mrb[16].mxu1 %v1547_v28 }
 0x2dd   :  { %1196 = vmatprep.mubr.bf16.mxu1 %v1552_v29 }
 0x2e4   :  { %1197 = vmatmul.mubr.bf16.gmra.mrb[20].mxu1 %v1559_v30 }
 0x2e5   :  { %1200 = vmatprep.mubr.bf16.mxu1 %v1564_v31 }
 0x2ec   :  { %1201 = vmatmul.mubr.bf16.gmra.mrb[24].mxu1 %v1571_v32 }
 0x3af   :  { %v1190_v19 = vpop.f32.mrb[32].mxu0  ;;  %v1194_v21 = vpop.f32.mrb[16].mxu1 }
 0x3b0   :  { %v840_v22 = vmul.f32 %v1190_v19, %v1489_v34  ;;  %v844_v25 = vmul.f32 %v1194_v21, %v1499_v40  ;;  %v775_v28 = vpop.f32.mrb[33].mxu0  ;;  %v791_v23 = vpop.f32.mrb[17].mxu1 }
 0x3b1   :  { %v838_v29 = vmul.f32 %v775_v28, %v1487_v33  ;;  %v842_v30 = vmul.f32 %v791_v23, %v1495_v37  ;;  %v1191_v31 = vpop.f32.mrb[34].mxu0  ;;  %v1195_v24 = vpop.f32.mrb[18].mxu1 }
 0x3b2   :  { %v858_v32 = vadd.f32 %v1646_v20, %v840_v22  ;;  %v862_v26 = vadd.f32 %v1646_v20, %v844_v25  ;;  %v841_v39 = vmul.f32 %v1191_v31, %v1493_v36  ;;  %v845_v45 = vmul.f32 %v1195_v24, %v1501_v42  ;;  %v778_v41 = vpop.f32.mrb[35].mxu0  ;;  %v794_v34 = vpop.f32.mrb[19].mxu1 }
 0x3b3   :  { %v856_v40 = vadd.f32 %v1646_v20, %v838_v29  ;;  %v860_v43 = vadd.f32 %v1646_v20, %v842_v30  ;;  %v839_v33 = vmul.f32 %v778_v41, %v1491_v35  ;;  %v843_v37 = vmul.f32 %v794_v34, %v1497_v38 }
 0x3b4   :  { %v874_v44 = vsub.f32 0.0, %v858_v32  ;;  %v878_v46 = vsub.f32 0.0, %v862_v26  ;;  %v859_v47 = vadd.f32 %v1646_v20, %v841_v39  ;;  %v863_v27 = vadd.f32 %v1646_v20, %v845_v45 }
 0x3b5   :  { %v872_v48 = vsub.f32 0.0, %v856_v40  ;;  %v876_v36 = vsub.f32 0.0, %v860_v43  ;;  %v857_v42 = vadd.f32 %v1646_v20, %v839_v33  ;;  %v861_v49 = vadd.f32 %v1646_v20, %v843_v37 }
 0x3b6   :  { %v892_v50 = vmul.f32 1.442695, %v874_v44  ;;  %v900_v53 = vmul.f32 1.442695, %v878_v46  ;;  %v875_v54 = vsub.f32 0.0, %v859_v47  ;;  %v879_v55 = vsub.f32 0.0, %v863_v27 }
 0x3b7   :  { %v888_v56 = vmul.f32 1.442695, %v872_v48  ;;  %v896_v35 = vmul.f32 1.442695, %v876_v36  ;;  %v873_v57 = vsub.f32 0.0, %v857_v42  ;;  %v877_v38 = vsub.f32 0.0, %v861_v49 }
 0x3b8   :  { %1251 = vpow2.f32 %v892_v50  ;;  %v894_v58 = vmul.f32 1.442695, %v875_v54  ;;  %v1198_v59 = vpop.f32.mrb[20].mxu1  ;;  %v902_v60 = vmul.f32 1.442695, %v879_v55 }
 0x3b9   :  { %1253 = vpow2.f32 %v900_v53  ;;  %v848_v62 = vmul.f32 %v1198_v59, %v1515_v61  ;;  %v807_v0 = vpop.f32.mrb[21].mxu1  ;;  %v890_v1 = vmul.f32 1.442695, %v873_v57  ;;  %v898_v5 = vmul.f32 1.442695, %v877_v38 }
 0x3ba   :  { %1255 = vpow2.f32 %v888_v56  ;;  %v846_v2 = vmul.f32 %v807_v0, %v1507_v51  ;;  %v1199_v3 = vpop.f32.mrb[22].mxu1 }
 0x3bb   :  { %1257 = vpow2.f32 %v896_v35  ;;  %v866_v6 = vadd.f32 %v1646_v20, %v848_v62  ;;  %v849_v7 = vmul.f32 %v1199_v3, %v1517_v63  ;;  %v810_v9 = vpop.f32.mrb[23].mxu1 }
 0x3bc   :  { %1259 = vpow2.f32 %v894_v58  ;;  %v864_v10 = vadd.f32 %v1646_v20, %v846_v2  ;;  %v847_v11 = vmul.f32 %v810_v9, %v1509_v52 }
 0x3bd   :  { %1261 = vpow2.f32 %v902_v60  ;;  %v882_v61 = vsub.f32 0.0, %v866_v6  ;;  %v867_v12 = vadd.f32 %v1646_v20, %v849_v7 }
 0x3be   :  { %1263 = vpow2.f32 %v890_v1  ;;  %v880_v13 = vsub.f32 0.0, %v864_v10  ;;  %v865_v51 = vadd.f32 %v1646_v20, %v847_v11 }
 0x3bf   :  { %1265 = vpow2.f32 %v898_v5  ;;  %v908_v15 = vmul.f32 1.442695, %v882_v61  ;;  %v883_v17 = vsub.f32 0.0, %v867_v12  ;;  %v1202_v18 = vpop.f32.mrb[24].mxu1 }
 0x3c0   :  { %v904_v19 = vmul.f32 1.442695, %v880_v13  ;;  %v881_v63 = vsub.f32 0.0, %v865_v51  ;;  %v852_v21 = vmul.f32 %v1202_v18, %v1527_v14  ;;  %v823_v22 = vpop.f32.mrb[25].mxu1 }
 0x3c1   :  { %1267 = vpow2.f32 %v908_v15  ;;  %v910_v25 = vmul.f32 1.442695, %v883_v17  ;;  %v1203_v52 = vpop.f32.mrb[26].mxu1  ;;  %v850_v30 = vmul.f32 %v823_v22, %v1519_v4 }
 0x3c2   :  { %v1252_v28 = vpop.eup %1251  ;;  %1269 = vpow2.f32 %v904_v19  ;;  %v906_v23 = vmul.f32 1.442695, %v881_v63  ;;  %v870_v29 = vadd.f32 %v1646_v20, %v852_v21  ;;  %v826_v31 = vpop.f32.mrb[27].mxu1  ;;  %v853_v26 = vmul.f32 %v1203_v52, %v1529_v16 }
 0x3c3   :  { %v1254_v24 = vpop.eup %1253  ;;  %v922_v32 = vadd.f32 1.0, %v1252_v28  ;;  %1271 = vpow2.f32 %v910_v25  ;;  %v851_v14 = vmul.f32 %v826_v31, %v1523_v8  ;;  %v868_v4 = vadd.f32 %v1646_v20, %v850_v30 }
 0x3c4   :  { %v1256_v39 = vpop.eup %1255  ;;  %v926_v45 = vadd.f32 1.0, %v1254_v24  ;;  %1273 = vpow2.f32 %v906_v23  ;;  %v886_v40 = vsub.f32 0.0, %v870_v29  ;;  %v871_v46 = vadd.f32 %v1646_v20, %v853_v26 }
 0x3c5   :  { %v1258_v41 = vpop.eup %1257  ;;  %1275 = vrcp.f32 %v922_v32  ;;  %v920_v34 = vadd.f32 1.0, %v1256_v39  ;;  %v869_v27 = vadd.f32 %v1646_v20, %v851_v14  ;;  %v884_v49 = vsub.f32 0.0, %v868_v4 }
 0x3c6   :  { %v1260_v43 = vpop.eup %1259  ;;  %1277 = vrcp.f32 %v926_v45  ;;  %v924_v33 = vadd.f32 1.0, %v1258_v41  ;;  %v916_v36 = vmul.f32 1.442695, %v886_v40  ;;  %v887_v53 = vsub.f32 0.0, %v871_v46 }
 0x3c7   :  { %v1262_v37 = vpop.eup %1261  ;;  %1279 = vrcp.f32 %v920_v34  ;;  %v923_v44 = vadd.f32 1.0, %v1260_v43  ;;  %v885_v56 = vsub.f32 0.0, %v869_v27  ;;  %v912_v58 = vmul.f32 1.442695, %v884_v49 }
 0x3c8   :  { %v1264_v16 = vpop.eup %1263  ;;  %1281 = vrcp.f32 %v924_v33  ;;  %v927_v47 = vadd.f32 1.0, %v1262_v37  ;;  %v918_v62 = vmul.f32 1.442695, %v887_v53 }
 0x3c9   :  { %v1266_v8 = vpop.eup %1265  ;;  %1283 = vrcp.f32 %v923_v44  ;;  %v921_v48 = vadd.f32 1.0, %v1264_v16  ;;  %v914_v1 = vmul.f32 1.442695, %v885_v56 }
 0x3ca   :  { %1285 = vrcp.f32 %v927_v47  ;;  %v925_v42 = vadd.f32 1.0, %v1266_v8 }
 0x3cb   :  { %v1268_v50 = vpop.eup %1267  ;;  %1287 = vrcp.f32 %v921_v48 }
 0x3cc   :  { %v1270_v54 = vpop.eup %1269  ;;  %1289 = vrcp.f32 %v925_v42  ;;  %v930_v55 = vadd.f32 1.0, %v1268_v50 }
 0x3cd   :  { %v1272_v35 = vpop.eup %1271  ;;  %v928_v57 = vadd.f32 1.0, %v1270_v54  ;;  %1291 = vpow2.f32 %v916_v36 }
 0x3ce   :  { %v1274_v38 = vpop.eup %1273  ;;  %1293 = vrcp.f32 %v930_v55  ;;  %v931_v20 = vadd.f32 1.0, %v1272_v35 }
 0x3cf   :  { %v1276_v59 = vpop.eup %1275  ;;  %1295 = vrcp.f32 %v928_v57  ;;  %v929_v60 = vadd.f32 1.0, %v1274_v38 }
 0x3d0   :  { %v1278_v0 = vpop.eup %1277  ;;  %970 = vst [vmem:[#allocation3 + $0x10] sm:$0xff] %v1276_v59  ;;  %1297 = vrcp.f32 %v931_v20 }
 0x3d1   :  { %v1280_v2 = vpop.eup %1279  ;;  %974 = vst [vmem:[#allocation3 + $0x30] sm:$0xff] %v1278_v0  ;;  %1299 = vrcp.f32 %v929_v60 }
 0x3d2   :  { %v1282_v3 = vpop.eup %1281  ;;  %968 = vst [vmem:[#allocation3] sm:$0xff] %v1280_v2  ;;  %1301 = vpow2.f32 %v912_v58 }
 0x3d3   :  { %v1284_v5 = vpop.eup %1283  ;;  %972 = vst [vmem:[#allocation3 + $0x20] sm:$0xff] %v1282_v3  ;;  %1303 = vpow2.f32 %v918_v62 }
 0x3d4   :  { %v1286_v6 = vpop.eup %1285  ;;  %971 = vst [vmem:[#allocation3 + $0x18] sm:$0xff] %v1284_v5  ;;  %1305 = vpow2.f32 %v914_v1 }
 0x3d5   :  { %v1288_v7 = vpop.eup %1287  ;;  %975 = vst [vmem:[#allocation3 + $0x38] sm:$0xff] %v1286_v6 }
 0x3d6   :  { %v1290_v9 = vpop.eup %1289  ;;  %969 = vst [vmem:[#allocation3 + $0x8] sm:$0xff] %v1288_v7 }
 0x3d7   :  { %v1292_v10 = vpop.eup %1291  ;;  %973 = vst [vmem:[#allocation3 + $0x28] sm:$0xff] %v1290_v9 }
 0x3d8   :  { %v1294_v11 = vpop.eup %1293  ;;  %v934_v61 = vadd.f32 1.0, %v1292_v10 }
 0x3d9   :  { %v1296_v12 = vpop.eup %1295  ;;  %978 = vst [vmem:[#allocation3 + $0x50] sm:$0xff] %v1294_v11 }
 0x3da   :  { %v1298_v13 = vpop.eup %1297  ;;  %976 = vst [vmem:[#allocation3 + $0x40] sm:$0xff] %v1296_v12  ;;  %1307 = vrcp.f32 %v934_v61 }
 0x3db   :  { %v1300_v51 = vpop.eup %1299  ;;  %979 = vst [vmem:[#allocation3 + $0x58] sm:$0xff] %v1298_v13 }
 0x3dc   :  { %v1302_v15 = vpop.eup %1301  ;;  %977 = vst [vmem:[#allocation3 + $0x48] sm:$0xff] %v1300_v51 }
 0x3dd   :  { %v1304_v17 = vpop.eup %1303  ;;  %v932_v18 = vadd.f32 1.0, %v1302_v15 }
 0x3de   :  { %v1306_v19 = vpop.eup %1305  ;;  %v935_v63 = vadd.f32 1.0, %v1304_v17 }
 0x3df   :  { %1309 = vrcp.f32 %v932_v18  ;;  %v933_v21 = vadd.f32 1.0, %v1306_v19 }
 0x3e0   :  { %1311 = vrcp.f32 %v935_v63 }
 0x3e1   :  { %1313 = vrcp.f32 %v933_v21 }
 0x3e4   :  { %v1308_v22 = vpop.eup %1307 }
 0x3e5   :  { %982 = vst [vmem:[#allocation3 + $0x70] sm:$0xff] %v1308_v22 }
 0x3e9   :  { %v1310_v25 = vpop.eup %1309 }
 0x3ea   :  { %v1312_v52 = vpop.eup %1311  ;;  %980 = vst [vmem:[#allocation3 + $0x60] sm:$0xff] %v1310_v25 }
 0x3eb   :  { %v1314_v28 = vpop.eup %1313  ;;  %983 = vst [vmem:[#allocation3 + $0x78] sm:$0xff] %v1312_v52 }
 0x3ec   :  { %981 = vst [vmem:[#allocation3 + $0x68] sm:$0xff] %v1314_v28 }
 0x3ed   :  { %1326 = shalt.err (!%p1323_p4)
}
 0x3ee   :  { %s1327_s11 = scalar_lea.hbm %s1699_s7, 2048 }
 0x3ef   :  { %p1328_p5 = scmp.ne.s32.totalorder %s1699_s7, %s1327_s11  ;;  %p1331_p6 = scmp.lt.u32.totalorder %s1327_s11, %s1699_s7 }
 0x3f1   :  { %p1333_p7 = pnand %p1331_p6, %p1328_p5 }
 0x3f3   :  { %1336 = shalt.err (!%p1333_p7)
}
 0x3f4   :  { %s1341_s16 = smov 128   ;;  %s1342_s17 = smov 8  }
 0x3f5   :  { %995 = dma.vmem_to_hbm [thread:$0]  %s990_s8, 2048, %s1699_s7, [#allocation4], %s1341_s16, %s1341_s16, %s1342_s17  }
 0x3f6   :  { %1337 = dma.done.wait [#allocation4], 2048  }
 0x3f7   :  { %1338 = vsyncadd [#allocation4], 4294965248 }
 0x3f8   :  { %999 = vsyncpa [#allocation4], 1 }

</bundles_post_ra>
